<compile_context>
chip_gen: v7x
topology: tpu7x:2x2x1
jax: 0.10.0
libtpu: 0.0.40
codegen_flags: <defaults>
</compile_context>

<pallas_src>
import functools

import jax
import jax.numpy as jnp
from jax import lax
from jax.experimental import pallas as pl
from jax.experimental.pallas import tpu as pltpu


# Rows per grid step (multiple of 8). (2048, 128) f32 = 1 MiB per buffer, so the
# double-buffered output stays far below the scoped VMEM default on v5e/v6e/v7x.
_TILE_ROWS = 2048


def _round_up(a: int, b: int) -> int:
    return ((a + b - 1) // b) * b


def _random_one_hot_kernel(seed_ref, out_ref, *, num_classes: int,
                           groups_per_row: int):
    """Counter-hash RNG -> class id in [0, num_classes) -> one-hot float32.

    out_ref block: (TILE, out_cols).  Lane j of a row holds class (j % C) of
    logical draw (row * g + j // C); leftover lanes (j >= g*C) are zeroed.
    """
    C = num_classes
    g = groups_per_row
    tile_rows, out_cols = out_ref.shape

    seed = seed_ref[0]

    row_in_tile = lax.broadcasted_iota(jnp.int32, (tile_rows, out_cols), 0)
    lane = lax.broadcasted_iota(jnp.int32, (tile_rows, out_cols), 1)

    if g == 1:
        # One draw per physical row; lanes >= C can never match r < C.
        group = 0
        cls = lane
    else:
        # lane // C and lane % C without an integer divide (TPU VPU has none):
        # multiply-high with ceil(2^20 / C); exact for lane < 128, C <= 128.
        magic = ((1 << 20) + C - 1) // C
        group = lax.shift_right_logical(lane * magic, 20)
        cls = lane - group * C

    global_row = pl.program_id(0) * tile_rows + row_in_tile
    draw = global_row * g + group            # unique id per one-hot vector

    # splitmix32-style counter RNG (murmur3 fmix32 finalizer): identical across
    # the C lanes of a group, pure per-lane int32 VPU ops, no HBM/cross-lane
    # traffic.  int32 multiplies wrap mod 2^32, which is exactly what we want.
    GOLDEN = jnp.int32(-1640531527)          # 0x9E3779B9
    M1 = jnp.int32(-2048144789)              # 0x85EBCA6B
    M2 = jnp.int32(-1028477387)              # 0xC2B2AE35
    h = draw * GOLDEN + seed
    h = h ^ lax.shift_right_logical(h, 16)
    h = h * M1
    h = h ^ lax.shift_right_logical(h, 13)
    h = h * M2
    h = h ^ lax.shift_right_logical(h, 16)

    # Top 16 bits -> [0, C) via multiply-high (no divide; ~C/2^16 bias).
    hi = lax.shift_right_logical(h, 16)      # in [0, 2**16)
    r = lax.shift_right_logical(hi * C, 16)  # in [0, C)

    one = cls == r
    if g > 1 and g * C < out_cols:           # zero the padded lanes
        one = jnp.logical_and(one, lane < g * C)
    out_ref[...] = one.astype(jnp.float32)


def random_host_forward(x, *, dimension: int, seed: int = 0):
    """Pallas equivalent of RandomHostModule.forward(x)."""
    output_dim = 2 ** dimension - dimension - 1
    assert output_dim >= 1, "dimension must be >= 2"
    assert dimension <= 15, "hi * C must stay inside int32 (dimension <= 15)"
    batch = x.shape[0]
    C = output_dim

    if C <= 128:
        g = 128 // C                 # one-hot vectors packed per 128-lane row
        out_cols = 128               # lane-dense, unmasked stores
    else:
        g = 1                        # fallback: one vector per row
        out_cols = C

    rows = -(-batch // g)            # physical output rows needed

    # Tile selection: multiple of 8 sublanes; >= 2 grid steps once there is
    # enough work (v7x has 2 TensorCores), capped at _TILE_ROWS.
    if rows >= 64:
        tile = min(_TILE_ROWS, _round_up(-(-rows // 2), 8))
    else:
        tile = _round_up(rows, 8)
    rows_alloc = _round_up(rows, tile)
    grid = (rows_alloc // tile,)

    seed_arr = jnp.asarray([seed], dtype=jnp.int32)

    kernel = functools.partial(
        _random_one_hot_kernel, num_classes=C, groups_per_row=g)

    out = pl.pallas_call(
        kernel,
        out_shape=jax.ShapeDtypeStruct((rows_alloc, out_cols), jnp.float32),
        grid=grid,
        in_specs=[pl.BlockSpec(memory_space=pltpu.MemorySpace.SMEM)],
        out_specs=pl.BlockSpec((tile, out_cols), lambda i: (i, 0)),
        compiler_params=pltpu.CompilerParams(
            dimension_semantics=("parallel",)),
    )(seed_arr)

    if C <= 128:
        out = out[:, : g * C].reshape(rows_alloc * g, C)
    return out[:batch]


if __name__ == "__main__":
    # Module config consistent with the Hironaka game inputs.
    dimension = 3          # -> output_dim = 2**3 - 3 - 1 = 4 (packed path, g = 32)
    max_num_points = 8
    batch = 2
    output_dim = 2 ** dimension - dimension - 1

    # Deterministic example input (only x.shape[0] is consumed by the forward).
    key = jax.random.PRNGKey(0)
    x = jax.random.normal(key, (batch, max_num_points, dimension), dtype=jnp.float32)

    out = jax.block_until_ready(random_host_forward(x, dimension=dimension, seed=0))
    assert out.shape == (batch, output_dim), out.shape
    assert out.dtype == jnp.float32, out.dtype
    assert bool(jnp.all(jnp.sum(out, axis=-1) == 1.0))
    assert bool(jnp.all((out == 0.0) | (out == 1.0)))

    # Same seed -> same draws (deterministic, tiling-independent).
    out_b = jax.block_until_ready(random_host_forward(x, dimension=dimension, seed=0))
    assert bool(jnp.all(out == out_b))

    # Exercise the padded-lane path (output_dim = 11 does not divide 128) and a
    # multi-step grid, plus a loose uniformity check.
    dim2 = 4
    od2 = 2 ** dim2 - dim2 - 1       # 11
    batch2 = 1000
    x2 = jax.random.normal(jax.random.PRNGKey(1),
                           (batch2, max_num_points, dim2), dtype=jnp.float32)
    out2 = jax.block_until_ready(random_host_forward(x2, dimension=dim2, seed=1))
    assert out2.shape == (batch2, od2), out2.shape
    assert bool(jnp.all(jnp.sum(out2, axis=-1) == 1.0))
    assert bool(jnp.all((out2 == 0.0) | (out2 == 1.0)))
    counts = jnp.sum(out2, axis=0)
    assert bool(jnp.all(counts > 0))  # every class is drawn at least once

    print("KERNEL_OK")
</pallas_src>

<mosaic_0001>
module attributes {stable_mosaic.version = 11 : i64} {
  func.func @_random_one_hot_kernel(%arg0: i32, %arg1: memref<1xi32, #tpu.memory_space<smem>>, %arg2: memref<8x128xf32, #tpu.memory_space<vmem>>) attributes {dimension_semantics = [#tpu.dimension_semantics<parallel>], iteration_bounds = array<i64: 1>, scalar_prefetch = 0 : i64, scratch_operands = 0 : i64, tpu.core_type = #tpu.core_type<tc>, window_params = [{transform_indices = @transform_0, window_bounds = array<i64: 1>}, {transform_indices = @transform_1, window_bounds = array<i64: 8, 128>}]} {
    %c0 = arith.constant 0 : index
    %0 = memref.load %arg1[%c0] : memref<1xi32, #tpu.memory_space<smem>>
    %1 = tpu.iota {dimensions = array<i32: 0>} : vector<8x128xi32>
    %2 = tpu.iota {dimensions = array<i32: 1>} : vector<8x128xi32>
    %c262144_i32 = arith.constant 262144 : i32
    %3 = vector.broadcast %c262144_i32 : i32 to vector<8x128xi32>
    %4 = arith.muli %2, %3 : vector<8x128xi32>
    %c20_i32 = arith.constant 20 : i32
    %5 = vector.broadcast %c20_i32 : i32 to vector<8x128xi32>
    %6 = arith.shrui %4, %5 : vector<8x128xi32>
    %c4_i32 = arith.constant 4 : i32
    %7 = vector.broadcast %c4_i32 : i32 to vector<8x128xi32>
    %8 = arith.muli %6, %7 : vector<8x128xi32>
    %9 = arith.subi %2, %8 : vector<8x128xi32>
    %c8_i32 = arith.constant 8 : i32
    %10 = arith.muli %arg0, %c8_i32 : i32
    %11 = vector.broadcast %10 : i32 to vector<8x128xi32>
    %12 = arith.addi %11, %1 : vector<8x128xi32>
    %c32_i32 = arith.constant 32 : i32
    %13 = vector.broadcast %c32_i32 : i32 to vector<8x128xi32>
    %14 = arith.muli %12, %13 : vector<8x128xi32>
    %15 = arith.addi %14, %6 : vector<8x128xi32>
    %c-1640531527_i32 = arith.constant -1640531527 : i32
    %16 = vector.broadcast %c-1640531527_i32 : i32 to vector<8x128xi32>
    %17 = arith.muli %15, %16 : vector<8x128xi32>
    %18 = vector.broadcast %0 : i32 to vector<8x128xi32>
    %19 = arith.addi %17, %18 : vector<8x128xi32>
    %c16_i32 = arith.constant 16 : i32
    %20 = vector.broadcast %c16_i32 : i32 to vector<8x128xi32>
    %21 = arith.shrui %19, %20 : vector<8x128xi32>
    %22 = arith.xori %19, %21 : vector<8x128xi32>
    %c-2048144789_i32 = arith.constant -2048144789 : i32
    %23 = vector.broadcast %c-2048144789_i32 : i32 to vector<8x128xi32>
    %24 = arith.muli %22, %23 : vector<8x128xi32>
    %c13_i32 = arith.constant 13 : i32
    %25 = vector.broadcast %c13_i32 : i32 to vector<8x128xi32>
    %26 = arith.shrui %24, %25 : vector<8x128xi32>
    %27 = arith.xori %24, %26 : vector<8x128xi32>
    %c-1028477387_i32 = arith.constant -1028477387 : i32
    %28 = vector.broadcast %c-1028477387_i32 : i32 to vector<8x128xi32>
    %29 = arith.muli %27, %28 : vector<8x128xi32>
    %c16_i32_0 = arith.constant 16 : i32
    %30 = vector.broadcast %c16_i32_0 : i32 to vector<8x128xi32>
    %31 = arith.shrui %29, %30 : vector<8x128xi32>
    %32 = arith.xori %29, %31 : vector<8x128xi32>
    %c16_i32_1 = arith.constant 16 : i32
    %33 = vector.broadcast %c16_i32_1 : i32 to vector<8x128xi32>
    %34 = arith.shrui %32, %33 : vector<8x128xi32>
    %c4_i32_2 = arith.constant 4 : i32
    %35 = vector.broadcast %c4_i32_2 : i32 to vector<8x128xi32>
    %36 = arith.muli %34, %35 : vector<8x128xi32>
    %c16_i32_3 = arith.constant 16 : i32
    %37 = vector.broadcast %c16_i32_3 : i32 to vector<8x128xi32>
    %38 = arith.shrui %36, %37 : vector<8x128xi32>
    %39 = arith.cmpi eq, %9, %38 : vector<8x128xi32>
    %40 = arith.extui %39 : vector<8x128xi1> to vector<8x128xi32>
    %41 = arith.sitofp %40 : vector<8x128xi32> to vector<8x128xf32>
    %c0_4 = arith.constant 0 : index
    %c0_5 = arith.constant 0 : index
    %42 = vector.load %arg2[%c0_4, %c0_5] : memref<8x128xf32, #tpu.memory_space<vmem>>, vector<8x128xf32>
    tpu.vector_store %arg2[%c0_4, %c0_5], %41 {strides = array<i32>} : memref<8x128xf32, #tpu.memory_space<vmem>>, vector<8x128xf32>,
    return
  }
  func.func @transform_0(%arg0: i32) -> i32 {
    %c0_i32 = arith.constant 0 : i32
    %c0_i32_0 = arith.constant 0 : i32
    return %c0_i32 : i32
  }
  func.func @transform_1(%arg0: i32) -> (i32, i32) {
    %c0_i32 = arith.constant 0 : i32
    %c0_i32_0 = arith.constant 0 : i32
    return %arg0, %c0_i32 : i32, i32
  }
}

</mosaic_0001>

<bundles_post_ra>
// kernel: tpu_custom_call.1
= control target key start
LH: loop header
LB: loop body
LE: loop exit
PB: predicated region body
PF: predicated region fallthrough
CT: control target
= control target key end

     0   :  { %v11_v0 = vlaneseq  ;;  %s110_s0 = inlined_call_operand.<no memory space> [shape: s32[1], index: 0, kind: input, shape index: {}]   ;;  %s111_s1 = inlined_call_operand.hbm [shape: f32[8,128], index: 1, kind: output, shape index: {}]  }
   0x1   :  { %7 = vsyncpa [#allocation4], 0  ;;  %v25_v7 = vstv %s110_s0  ;;  %s83_s8 = smov [#allocation3]   ;;  %v84_v23 = vmov 0.0  }
   0x2   :  { %v12_v1 = vshrl.u32 %v11_v0, 7  ;;  %v14_v2 = vand.u32 127, %v11_v0  ;;  %s48_s9 = sshll.u32 %s83_s8, 4  ;;  %s49_s9 = int_to_ptr.vmem [resolvable:$true] %s48_s9 }
   0x3   :  { %s59_s0 = scalar_lea.vmem %s49_s9, 128  ;;  %p64_p1 = scmp.lt.s32.totalorder %s49_s9, %s49_s9 }
   0x4   :  { %v15_v3 = vmul.u32 262144, %v14_v2  ;;  %v22_v4 = vmul.u32 32, %v12_v1  ;;  %p60_p0 = scmp.ne.s32.totalorder %s49_s9, %s59_s0  ;;  %p65_p2 = scmp.lt.s32.totalorder %s59_s0, %s59_s0 }
   0x6   :  { %v16_v5 = vshrl.u32 %v15_v3, 20  ;;  %p66_p3 = por %p65_p2, %p64_p1 }
   0x8   :  { %v23_v6 = vadd.s32 %v22_v4, %v16_v5  ;;  %v17_v17 = vmul.u32 4, %v16_v5  ;;  %p67_p4 = pnand %p66_p3, %p60_p0 }
   0xa   :  { %v24_v8 = vmul.u32 2654435769, %v23_v6  ;;  %v18_v20 = vsub.s32 %v14_v2, %v17_v17 }
   0xc   :  { %v26_v9 = vadd.s32 %v25_v7, %v24_v8 }
   0xe   :  { %v27_v10 = vshrl.u32 %v26_v9, 16 }
  0x10   :  { %v28_v11 = vxor.u32 %v27_v10, %v26_v9 }
  0x12   :  { %v29_v12 = vmul.u32 2246822507, %v28_v11 }
  0x14   :  { %v30_v13 = vshrl.u32 %v29_v12, 13 }
  0x16   :  { %v31_v14 = vxor.u32 %v30_v13, %v29_v12 }
  0x18   :  { %v32_v15 = vmul.u32 3266489909, %v31_v14 }
  0x1a   :  { %v33_v16 = vshrl.u32 %v32_v15, 16 }
  0x1c   :  { %v34_v18 = vxor.u32 %v33_v16, %v32_v15 }
  0x1e   :  { %v35_v19 = vshrl.u32 %v34_v18, 16 }
  0x20   :  { %v36_v21 = vmul.u32 4, %v35_v19 }
  0x22   :  { %v37_v22 = vshrl.u32 %v36_v21, 16 }
  0x24   :  { %vm38_vm0 = vcmp.eq.s32.totalorder %v18_v20, %v37_v22 }
  0x25   :  { %v56_v24 = vsel %vm38_vm0, 1.0, %v84_v23 }
  0x26   :  { %41 = vst [vmem:[#allocation3] sm:$0xff] %v56_v24 }
  0x27   :  { %70 = shalt.err (!%p67_p4)
}
  0x28   :  { %s71_s12 = scalar_lea.hbm %s111_s1, 128 }
  0x29   :  { %p72_p5 = scmp.ne.s32.totalorder %s111_s1, %s71_s12  ;;  %p75_p6 = scmp.lt.u32.totalorder %s71_s12, %s111_s1 }
  0x2b   :  { %p77_p7 = pnand %p75_p6, %p72_p5 }
  0x2d   :  { %80 = shalt.err (!%p77_p7)
}
  0x2e   :  { %51 = dma.vmem_to_hbm [thread:$0]  %s49_s9, 128, %s111_s1, [#allocation4]  }
  0x2f   :  { %81 = dma.done.wait [#allocation4], 128  }
  0x30   :  { %82 = vsyncadd [#allocation4], 4294967168 }
  0x31   :  { %55 = vsyncpa [#allocation4], 1 }

</bundles_post_ra>
